<compile_context>
chip_gen: v7x
topology: tpu7x:2x2x1
jax: 0.10.0
libtpu: 0.0.40
codegen_flags: <defaults>
</compile_context>

<pallas_src>
import functools

import jax
import jax.numpy as jnp
from jax.experimental import pallas as pl
from jax.experimental.pallas import tpu as pltpu


def _round_up(x: int, m: int) -> int:
    return (x + m - 1) // m * m


def _pick_tile(padded: int, align: int, cap: int) -> int:
    """Largest multiple of `align` that exactly divides `padded` and is <= cap.
    `padded` is already a multiple of `align`, so this always succeeds (>= align)."""
    if padded <= cap:
        return padded
    t = (cap // align) * align
    while t >= align:
        if padded % t == 0:
            return t
        t -= align
    return align


def _linear_kernel(x_ref, w_ref, b_ref, o_ref, acc_ref, *, compute_dtype):
    """Tiled fused-linear kernel.

    Accumulator starts at the broadcast bias, accumulates X @ W over the K grid
    axis, and writes out on the last K step.  Operands are cast to compute_dtype
    in-kernel (VPU cast is free relative to MXU) so no pre-cast HBM copy exists.
    """
    k = pl.program_id(2)

    @pl.when(k == 0)
    def _():
        acc_ref[...] = jnp.broadcast_to(
            b_ref[...].astype(jnp.float32), acc_ref.shape
        )

    exact_f32 = jnp.dtype(compute_dtype) == jnp.dtype(jnp.float32)
    precision = jax.lax.Precision.HIGHEST if exact_f32 else None
    acc_ref[...] += jnp.dot(
        x_ref[...].astype(compute_dtype),
        w_ref[...].astype(compute_dtype),
        preferred_element_type=jnp.float32,
        precision=precision,
    )

    @pl.when(k == pl.num_programs(2) - 1)
    def _():
        o_ref[...] = acc_ref[...].astype(o_ref.dtype)


@functools.partial(jax.jit, static_argnames=("compute_dtype",))
def custom_linear(x, w, b, *, compute_dtype=jnp.bfloat16):
    M, K = x.shape
    K2, N = w.shape
    assert K == K2 and b.shape == (N,)
    out_dtype = x.dtype

    # Pad only to hardware alignment; tiles below are exact divisors of the padded
    # dims, so no additional padding (and no large padded-work waste) ever occurs.
    Mp = _round_up(M, 8)
    Np = _round_up(N, 128)
    Kp = _round_up(K, 128)

    # Tile selection:
    #  - single M block when Mp <= 1024 (W streamed exactly once), else an exact
    #    divisor <= 512;
    #  - tn: exact divisor of Np, <= 512 (multiple of 128);
    #  - tk: exact divisor of Kp, <= 1024 (multiple of 128).
    tm = Mp if Mp <= 1024 else _pick_tile(Mp, 8, 512)
    tn = _pick_tile(Np, 128, 512)
    tk = _pick_tile(Kp, 128, 1024)

    # If the (i, j) grid collapses to a single block, split N so the "parallel" j
    # axis can be sharded across v7x's two TensorCores (no effect on v5e/v6e).
    if (Mp // tm) == 1 and (Np // tn) == 1 and Np >= 256:
        tn = Np // 2 if Np % 256 == 0 else 128

    # Alignment padding (tiny: <=7 rows / <=127 cols).  Skipped when already aligned,
    # so no extra HBM pass in the common aligned case.  Zero padding of K is inert;
    # padded M/N rows/cols are sliced off below.
    xc = x
    if (Mp, Kp) != (M, K):
        xc = jnp.pad(xc, ((0, Mp - M), (0, Kp - K)))
    wc = w
    if (Kp, Np) != (K, N):
        wc = jnp.pad(wc, ((0, Kp - K), (0, Np - N)))
    b2d = b.astype(jnp.float32).reshape(1, N)
    if Np != N:
        b2d = jnp.pad(b2d, ((0, 0), (0, Np - N)))

    grid = (Mp // tm, Np // tn, Kp // tk)

    # Explicit VMEM budget: double-buffered input/output tiles + f32 accumulator,
    # plus headroom.  Stays well under v7x's 64 MiB physical VMEM; raises v5e's
    # 16 MiB default scoped limit when bigger tiles are in play.
    in_isz = jnp.dtype(xc.dtype).itemsize
    out_isz = jnp.dtype(out_dtype).itemsize
    tile_bytes = (
        2 * (tm * tk + tk * tn) * in_isz   # X / W double buffers
        + 2 * tm * tn * out_isz            # output double buffer
        + tm * tn * 4                      # f32 accumulator scratch
        + 2 * tn * 4                       # bias tiles
    )
    vmem_limit = min(max(tile_bytes + (8 << 20), 32 << 20), 56 << 20)

    kernel = functools.partial(_linear_kernel, compute_dtype=compute_dtype)

    out_padded = pl.pallas_call(
        kernel,
        out_shape=jax.ShapeDtypeStruct((Mp, Np), out_dtype),
        grid_spec=pltpu.PrefetchScalarGridSpec(
            num_scalar_prefetch=0,
            grid=grid,
            in_specs=[
                pl.BlockSpec((tm, tk), lambda i, j, k: (i, k)),   # X tile
                pl.BlockSpec((tk, tn), lambda i, j, k: (k, j)),   # W tile
                pl.BlockSpec((1, tn), lambda i, j, k: (0, j)),    # bias tile
            ],
            out_specs=pl.BlockSpec((tm, tn), lambda i, j, k: (i, j)),
            scratch_shapes=[pltpu.VMEM((tm, tn), jnp.float32)],
        ),
        compiler_params=pltpu.CompilerParams(
            dimension_semantics=("parallel", "parallel", "arbitrary"),
            vmem_limit_bytes=int(vmem_limit),
        ),
    )(xc, wc, b2d)

    if (Mp, Np) != (M, N):
        out_padded = out_padded[:M, :N]
    return out_padded


class CustomPallasModule:
    """JAX analogue of deep500's CustomPytorchModule: forward just dispatches
    to the wrapped op."""

    def __init__(self, func):
        self.op = func

    def __call__(self, *args):
        return self.op(*args)


if __name__ == "__main__":
    key = jax.random.PRNGKey(0)
    k_x, k_w, k_b = jax.random.split(key, 3)

    # Small shapes consistent with a dense custom op (single-block fast path).
    M, K, N = 16, 64, 128
    x = jax.random.normal(k_x, (M, K), dtype=jnp.float32)
    w = jax.random.normal(k_w, (K, N), dtype=jnp.float32) * 0.05
    b = jax.random.normal(k_b, (N,), dtype=jnp.float32)

    module = CustomPallasModule(custom_linear)
    out = jax.block_until_ready(module(x, w, b))

    # Default path computes with bf16 multiplies / f32 accumulation -> compare
    # against the same-precision plain-JAX reference.
    x_bf = x.astype(jnp.bfloat16).astype(jnp.float32)
    w_bf = w.astype(jnp.bfloat16).astype(jnp.float32)
    ref = x_bf @ w_bf + b
    assert out.shape == (M, N)
    assert out.dtype == x.dtype
    assert jnp.allclose(out, ref, atol=1e-2, rtol=1e-2)

    # Exact-precision opt-out (f32 multiplies on the MXU).
    out_f32 = jax.block_until_ready(custom_linear(x, w, b, compute_dtype=jnp.float32))
    ref_f32 = x @ w + b
    assert jnp.allclose(out_f32, ref_f32, atol=5e-3, rtol=5e-3)

    # Larger, non-tile-multiple shape: exercises minimal-alignment padding
    # (304/768/512), single-M-block streaming and the 2-way N split.
    M2, K2_, N2 = 300, 700, 500
    x2 = jax.random.normal(k_x, (M2, K2_), dtype=jnp.float32)
    w2 = jax.random.normal(k_w, (K2_, N2), dtype=jnp.float32) * 0.05
    b2 = jax.random.normal(k_b, (N2,), dtype=jnp.float32)
    out2 = jax.block_until_ready(module(x2, w2, b2))
    ref2 = (
        x2.astype(jnp.bfloat16).astype(jnp.float32)
        @ w2.astype(jnp.bfloat16).astype(jnp.float32)
        + b2
    )
    assert out2.shape == (M2, N2)
    assert jnp.allclose(out2, ref2, atol=5e-2, rtol=5e-2)

    print("KERNEL_OK")
</pallas_src>

<mosaic_0001>
module attributes {stable_mosaic.version = 11 : i64} {
  func.func @_linear_kernel(%arg0: i32, %arg1: i32, %arg2: i32, %arg3: memref<16x128xf32, #tpu.memory_space<vmem>>, %arg4: memref<128x128xf32, #tpu.memory_space<vmem>>, %arg5: memref<1x128xf32, #tpu.memory_space<vmem>>, %arg6: memref<16x128xf32, #tpu.memory_space<vmem>>, %arg7: memref<16x128xf32, #tpu.memory_space<vmem>>) attributes {dimension_semantics = [#tpu.dimension_semantics<parallel>, #tpu.dimension_semantics<parallel>, #tpu.dimension_semantics<arbitrary>], iteration_bounds = array<i64: 1, 1, 1>, scalar_prefetch = 0 : i64, scratch_operands = 1 : i64, tpu.core_type = #tpu.core_type<tc>, window_params = [{transform_indices = @transform_0, window_bounds = array<i64: 16, 128>}, {transform_indices = @transform_1, window_bounds = array<i64: 128, 128>}, {transform_indices = @transform_2, window_bounds = array<i64: 1, 128>}, {transform_indices = @transform_3, window_bounds = array<i64: 16, 128>}]} {
    %c0_i32 = arith.constant 0 : i32
    %0 = arith.cmpi eq, %arg2, %c0_i32 : i32
    %1 = arith.extui %0 : i1 to i32
    %c0_i32_0 = arith.constant 0 : i32
    %2 = arith.cmpi ne, %1, %c0_i32_0 : i32
    scf.if %2 {
      %c0_10 = arith.constant 0 : index
      %c0_11 = arith.constant 0 : index
      %14 = vector.load %arg5[%c0_10, %c0_11] : memref<1x128xf32, #tpu.memory_space<vmem>>, vector<1x128xf32>
      %15 = vector.shape_cast %14 : vector<1x128xf32> to vector<1x128xf32>
      %16 = vector.broadcast %15 : vector<1x128xf32> to vector<16x128xf32>
      %c0_12 = arith.constant 0 : index
      %c0_13 = arith.constant 0 : index
      %17 = vector.load %arg7[%c0_12, %c0_13] : memref<16x128xf32, #tpu.memory_space<vmem>>, vector<16x128xf32>
      tpu.vector_store %arg7[%c0_12, %c0_13], %16 {strides = array<i32>} : memref<16x128xf32, #tpu.memory_space<vmem>>, vector<16x128xf32>,
    } else {
    }
    %c0 = arith.constant 0 : index
    %c0_1 = arith.constant 0 : index
    %3 = vector.load %arg7[%c0, %c0_1] : memref<16x128xf32, #tpu.memory_space<vmem>>, vector<16x128xf32>
    %c0_2 = arith.constant 0 : index
    %c0_3 = arith.constant 0 : index
    %4 = vector.load %arg3[%c0_2, %c0_3] : memref<16x128xf32, #tpu.memory_space<vmem>>, vector<16x128xf32>
    %5 = arith.truncf %4 : vector<16x128xf32> to vector<16x128xbf16>
    %c0_4 = arith.constant 0 : index
    %c0_5 = arith.constant 0 : index
    %6 = vector.load %arg4[%c0_4, %c0_5] : memref<128x128xf32, #tpu.memory_space<vmem>>, vector<128x128xf32>
    %7 = arith.truncf %6 : vector<128x128xf32> to vector<128x128xbf16>
    %cst = arith.constant dense<0.000000e+00> : vector<16x128xf32>
    %8 = tpu.matmul %5, %7, %cst {dimension_numbers = #tpu.dot_dimension_numbers<[1], [0], [0], [1], [0, 0, 1, 1], [], []>} : vector<16x128xbf16>, vector<128x128xbf16>, vector<16x128xf32> -> vector<16x128xf32>
    %9 = arith.addf %3, %8 : vector<16x128xf32>
    %c0_6 = arith.constant 0 : index
    %c0_7 = arith.constant 0 : index
    %10 = vector.load %arg7[%c0_6, %c0_7] : memref<16x128xf32, #tpu.memory_space<vmem>>, vector<16x128xf32>
    tpu.vector_store %arg7[%c0_6, %c0_7], %9 {strides = array<i32>} : memref<16x128xf32, #tpu.memory_space<vmem>>, vector<16x128xf32>,
    %c0_i32_8 = arith.constant 0 : i32
    %11 = arith.cmpi eq, %arg2, %c0_i32_8 : i32
    %12 = arith.extui %11 : i1 to i32
    %c0_i32_9 = arith.constant 0 : i32
    %13 = arith.cmpi ne, %12, %c0_i32_9 : i32
    scf.if %13 {
      %c0_10 = arith.constant 0 : index
      %c0_11 = arith.constant 0 : index
      %14 = vector.load %arg7[%c0_10, %c0_11] : memref<16x128xf32, #tpu.memory_space<vmem>>, vector<16x128xf32>
      %c0_12 = arith.constant 0 : index
      %c0_13 = arith.constant 0 : index
      %15 = vector.load %arg6[%c0_12, %c0_13] : memref<16x128xf32, #tpu.memory_space<vmem>>, vector<16x128xf32>
      tpu.vector_store %arg6[%c0_12, %c0_13], %14 {strides = array<i32>} : memref<16x128xf32, #tpu.memory_space<vmem>>, vector<16x128xf32>,
    } else {
    }
    return
  }
  func.func @transform_0(%arg0: i32, %arg1: i32, %arg2: i32) -> (i32, i32) {
    %c0_i32 = arith.constant 0 : i32
    return %arg0, %arg2 : i32, i32
  }
  func.func @transform_1(%arg0: i32, %arg1: i32, %arg2: i32) -> (i32, i32) {
    %c0_i32 = arith.constant 0 : i32
    return %arg2, %arg1 : i32, i32
  }
  func.func @transform_2(%arg0: i32, %arg1: i32, %arg2: i32) -> (i32, i32) {
    %c0_i32 = arith.constant 0 : i32
    %c0_i32_0 = arith.constant 0 : i32
    return %c0_i32, %arg1 : i32, i32
  }
  func.func @transform_3(%arg0: i32, %arg1: i32, %arg2: i32) -> (i32, i32) {
    %c0_i32 = arith.constant 0 : i32
    return %arg0, %arg1 : i32, i32
  }
}

</mosaic_0001>

<bundles_post_ra>
// kernel: custom_linear.1
= control target key start
LH: loop header
LB: loop body
LE: loop exit
PB: predicated region body
PF: predicated region fallthrough
CT: control target
= control target key end

     0   :  { %v185_v3 = vmov 0.0   ;;  %vm186_vm0 = vmmov 0   ;;  %s279_s0 = inlined_call_operand.vmem [shape: f32[16,128], index: 0, kind: input, shape index: {}]   ;;  %s280_s1 = inlined_call_operand.vmem [shape: f32[128,128], index: 1, kind: input, shape index: {}]   ;;  %s281_s2 = inlined_call_operand.vmem [shape: f32[1,128], index: 2, kind: input, shape index: {}]   ;;  %s282_s3 = inlined_call_operand.hbm [shape: f32[16,128], index: 3, kind: output, shape index: {}]  }
   0x1   :  { %v34_v0 = vld [vmem:[%s280_s1] sm:$0xff]  ;;  %v35_v1 = vld [vmem:[%s280_s1 + $0x8] sm:$0xff]  ;;  %v36_v2 = vld [vmem:[%s280_s1 + $0x10] sm:$0xff]  ;;  %136 = vmatprep.subr.bf16.mxu0 %v185_v3  ;;  %152 = vmatprep.mubr.msk.bf16.mxu0 %vm186_vm0, %v185_v3 }
   0x2   :  { %v50_v4 = vpack.c.bf16 %v35_v1, %v34_v0  ;;  %v37_v5 = vld [vmem:[%s280_s1 + $0x18] sm:$0xff]  ;;  %v38_v7 = vld [vmem:[%s280_s1 + $0x20] sm:$0xff]  ;;  %v39_v8 = vld [vmem:[%s280_s1 + $0x28] sm:$0xff] }
   0x3   :  { %v51_v6 = vpack.c.bf16 %v37_v5, %v36_v2 }
   0x4   :  { %137 = vmatpush3.bf16.msra.mxu0 %v50_v4 }
   0x5   :  { %138 = vmatprep.subr.bf16.mxu0 %v185_v3 }
   0x6   :  { %8 = vsyncpa [#allocation4], 0  ;;  %v52_v9 = vpack.c.bf16 %v39_v8, %v38_v7  ;;  %v40_v10 = vld [vmem:[%s280_s1 + $0x30] sm:$0xff]  ;;  %v41_v11 = vld [vmem:[%s280_s1 + $0x38] sm:$0xff]  ;;  %s187_s23 = smov [#allocation3]  }
   0x7   :  { %v53_v12 = vpack.c.bf16 %v41_v11, %v40_v10  ;;  %v42_v13 = vld [vmem:[%s280_s1 + $0x40] sm:$0xff]  ;;  %v43_v14 = vld [vmem:[%s280_s1 + $0x48] sm:$0xff]  ;;  %v44_v16 = vld [vmem:[%s280_s1 + $0x50] sm:$0xff] }
   0x8   :  { %139 = vmatpush3.bf16.msra.mxu0 %v51_v6  ;;  %v54_v15 = vpack.c.bf16 %v43_v14, %v42_v13  ;;  %v45_v17 = vld [vmem:[%s280_s1 + $0x58] sm:$0xff]  ;;  %v46_v19 = vld [vmem:[%s280_s1 + $0x60] sm:$0xff]  ;;  %v47_v20 = vld [vmem:[%s280_s1 + $0x68] sm:$0xff] }
   0x9   :  { %140 = vmatprep.subr.bf16.mxu0 %v185_v3  ;;  %v55_v18 = vpack.c.bf16 %v45_v17, %v44_v16  ;;  %v56_v21 = vpack.c.bf16 %v47_v20, %v46_v19  ;;  %v48_v22 = vld [vmem:[%s280_s1 + $0x70] sm:$0xff]  ;;  %v49_v23 = vld [vmem:[%s280_s1 + $0x78] sm:$0xff]  ;;  %v31_v25 = vld [vmem:[%s279_s0] sm:$0xff]  ;;  %s115_s1 = sshll.u32 %s187_s23, 4  ;;  %s116_s1 = int_to_ptr.vmem [resolvable:$true] %s115_s1 }
   0xa   :  { %v57_v24 = vpack.c.bf16 %v49_v23, %v48_v22  ;;  %v32_v26 = vld [vmem:[%s279_s0 + $0x8] sm:$0xff]  ;;  %v126_v28 = vld [vmem:[%s281_s2] ss:$0 sm:$0xff]  ;;  %s161_s0 = scalar_lea.vmem %s116_s1, 256  ;;  %p166_p1 = scmp.lt.s32.totalorder %s116_s1, %s116_s1 }
   0xb   :  { %v33_v27 = vpack.c.bf16 %v32_v26, %v31_v25  ;;  %p162_p0 = scmp.ne.s32.totalorder %s116_s1, %s161_s0  ;;  %p167_p2 = scmp.lt.s32.totalorder %s161_s0, %s161_s0 }
   0xc   :  { %141 = vmatpush3.bf16.msra.mxu0 %v52_v9 }
   0xd   :  { %142 = vmatprep.subr.bf16.mxu0 %v185_v3  ;;  %p168_p3 = por %p167_p2, %p166_p1 }
   0xf   :  { %p169_p4 = pnand %p168_p3, %p162_p0 }
  0x10   :  { %143 = vmatpush3.bf16.msra.mxu0 %v53_v12 }
  0x11   :  { %144 = vmatprep.subr.bf16.mxu0 %v185_v3 }
  0x14   :  { %145 = vmatpush3.bf16.msra.mxu0 %v54_v15 }
  0x15   :  { %146 = vmatprep.subr.bf16.mxu0 %v185_v3 }
  0x18   :  { %147 = vmatpush3.bf16.msra.mxu0 %v55_v18 }
  0x19   :  { %148 = vmatprep.subr.bf16.mxu0 %v185_v3 }
  0x1c   :  { %149 = vmatpush3.bf16.msra.mxu0 %v56_v21 }
  0x1d   :  { %150 = vmatprep.subr.bf16.mxu0 %v185_v3 }
  0x20   :  { %151 = vmatpush3.bf16.msra.mxu0 %v57_v24 }
  0x23   :  { %153 = vmatmul.mubr.bf16.vlgmr.msra.gmra.mrb[0].mxu0 %v33_v27 }
  0xf6   :  { %v92_v29 = vpop.f32.mrb[0].mxu0 }
  0xf7   :  { %v99_v30 = vadd.f32 %v126_v28, %v92_v29  ;;  %v154_v31 = vpop.f32.mrb[1].mxu0 }
  0xf8   :  { %v95_v32 = vpop.f32.mrb[2].mxu0 }
  0xf9   :  { %108 = vst [vmem:[#allocation3] sm:$0xff] %v99_v30  ;;  %v100_v33 = vadd.f32 %v126_v28, %v95_v32  ;;  %v155_v34 = vpop.f32.mrb[3].mxu0 }
  0xfb   :  { %109 = vst [vmem:[#allocation3 + $0x8] sm:$0xff] %v100_v33 }
  0xfc   :  { %172 = shalt.err (!%p169_p4)
}
  0xfd   :  { %s173_s25 = scalar_lea.hbm %s282_s3, 256 }
  0xfe   :  { %p174_p5 = scmp.ne.s32.totalorder %s282_s3, %s173_s25  ;;  %p177_p6 = scmp.lt.u32.totalorder %s173_s25, %s282_s3 }
 0x100   :  { %p179_p7 = pnand %p177_p6, %p174_p5 }
 0x102   :  { %182 = shalt.err (!%p179_p7)
}
 0x103   :  { %s188_s30 = smov 128   ;;  %s189_s4 = smov 8  }
 0x104   :  { %121 = dma.vmem_to_hbm [thread:$0]  %s116_s1, 256, %s282_s3, [#allocation4], %s188_s30, %s188_s30, %s189_s4  }
 0x105   :  { %183 = dma.done.wait [#allocation4], 256  }
 0x106   :  { %184 = vsyncadd [#allocation4], 4294967040 }
 0x107   :  { %125 = vsyncpa [#allocation4], 1 }

</bundles_post_ra>
